<compile_context>
chip_gen: v5e
topology: v5e:2x2
jax: 0.10.0
libtpu: 0.0.40
codegen_flags: <defaults>
</compile_context>

<pallas_src>
import math

import jax
import jax.numpy as jnp
from jax.experimental import pallas as pl
from jax.experimental.pallas import tpu as pltpu


def _normalisation_kernel(scale_ref, offset_ref, x_ref, o_ref):
    # scale_ref, offset_ref : VMEM (1, L) f32, resident across the grid
    # x_ref, o_ref          : VMEM (TB, L) row tiles
    # y = ((x - min)/(max - min) - 0.5) * 2 * range  folded into one FMA:
    #   scale  = 2*range/(max - min),  offset = -min*scale - range
    x = x_ref[...].astype(jnp.float32)
    o_ref[...] = (x * scale_ref[...] + offset_ref[...]).astype(o_ref.dtype)


def _num_tensorcores():
    """Best-effort TensorCore-per-chip count (megacore detection)."""
    try:
        kind = jax.devices()[0].device_kind.lower()
        if "v4" in kind or "v7" in kind or "7x" in kind:
            return 2
    except Exception:
        pass
    return 1


def _vmem_capacity_bytes():
    """Best-effort physical VMEM capacity; conservative (v7x) default."""
    try:
        return int(pltpu.get_tpu_info().vmem_capacity_bytes)
    except Exception:
        return 64 * 1024 * 1024


def normalisation(x, input_min, input_max, output_range):
    """x: (N, D); input_min/input_max: scalar or (D,); output_range: scalar."""
    N, D = x.shape
    dtype = x.dtype
    itemsize = jnp.dtype(dtype).itemsize

    input_min = jnp.broadcast_to(jnp.asarray(input_min, jnp.float32), (D,))
    input_max = jnp.broadcast_to(jnp.asarray(input_max, jnp.float32), (D,))
    out_range = jnp.asarray(output_range, jnp.float32)

    # Precompute on the tiny (D,) params (exact divide, essentially free).
    scale = (2.0 * out_range) / (input_max - input_min)   # (D,) f32
    offset = (-input_min) * scale - out_range              # (D,) f32

    # --- Lane-dense folding: last dim becomes a multiple of 128.
    fold = 128 // math.gcd(D, 128)   # smallest fold s.t. fold*D % 128 == 0
    L = fold * D

    rows = pl.cdiv(N, fold)
    ragged = (rows * fold != N)
    if ragged:
        # TODO(synk): the ragged tail costs one extra pad + slice HBM pass;
        # the divisible-N path below is completely copy-free.
        x2 = jnp.pad(x, ((0, rows * fold - N), (0, 0))).reshape(rows, L)
    else:
        # Free: contiguous row-major reinterpretation, no data movement.
        x2 = x.reshape(rows, L)

    # Per-feature params tiled across the folded lane axis (kept in f32).
    scale_l = jnp.tile(scale, fold).reshape(1, L)
    offset_l = jnp.tile(offset, fold).reshape(1, L)

    # --- Block sizing: byte-based, generation-aware.
    vmem_cap = _vmem_capacity_bytes()
    block_budget_bytes = (8 << 20) if vmem_cap >= (96 << 20) else (4 << 20)
    budget_rows = max(8, block_budget_bytes // (L * itemsize))

    if rows <= 8:
        block_rows = rows  # full-extent block (tiny-input case)
    else:
        block_rows = min(rows, budget_rows)
        block_rows = max(8, (block_rows // 8) * 8)

        # Megacore: on 2-TC parts give each core >= 2 blocks (>= 4 total) so
        # per-core double buffering survives the split.  Never forced on
        # single-TC parts (pure per-step overhead there).
        n_cores = _num_tensorcores()
        if n_cores > 1 and rows * L * itemsize >= (1 << 20):
            desired_blocks = 4 * n_cores
            if pl.cdiv(rows, block_rows) < desired_blocks:
                cand = pl.cdiv(rows, desired_blocks)
                cand = max(8, ((cand + 7) // 8) * 8)
                block_rows = min(block_rows, cand)

    grid = (pl.cdiv(rows, block_rows),)

    # Scoped VMEM: cover in+out double buffering (+ resident params) with
    # headroom, but never more than half the physical capacity.
    vmem_limit = int(min(vmem_cap // 2,
                         max(32 << 20, 6 * block_rows * L * itemsize)))

    out2 = pl.pallas_call(
        _normalisation_kernel,
        out_shape=jax.ShapeDtypeStruct((rows, L), dtype),
        grid=grid,
        in_specs=[
            pl.BlockSpec((1, L), lambda i: (0, 0)),           # scale (resident)
            pl.BlockSpec((1, L), lambda i: (0, 0)),           # offset (resident)
            pl.BlockSpec((block_rows, L), lambda i: (i, 0)),  # x tile
        ],
        out_specs=pl.BlockSpec((block_rows, L), lambda i: (i, 0)),
        compiler_params=pltpu.CompilerParams(
            dimension_semantics=("parallel",),
            vmem_limit_bytes=vmem_limit,
        ),
    )(scale_l, offset_l, x2)

    out = out2.reshape(rows * fold, D)
    if ragged:
        out = out[:N]
    return out


if __name__ == "__main__":
    key = jax.random.PRNGKey(0)
    N, D = 32, 8  # small batch, 8 features (MCTM-style dims)

    kx, _ = jax.random.split(key)
    x = jax.random.normal(kx, (N, D), dtype=jnp.float32) * 2.0

    # Deterministic per-feature normalisation parameters (input_max > input_min).
    input_min = -3.0 + 0.1 * jnp.arange(D, dtype=jnp.float32)
    input_max = 3.0 + 0.2 * jnp.arange(D, dtype=jnp.float32)
    output_range = 3.0

    def ref_fn(xv):
        return ((xv - input_min[None, :]) / (input_max - input_min)[None, :]
                - 0.5) * 2.0 * output_range

    # 1) divisible-N path (copy-free wrapper, partial-last-block grid).
    out = jax.block_until_ready(normalisation(x, input_min, input_max, output_range))
    assert out.shape == (N, D)
    assert out.dtype == jnp.float32
    assert jnp.allclose(out, ref_fn(x), atol=1e-5, rtol=1e-5)

    # 2) ragged-N path (exercises the pad + slice fallback and a 2-block grid).
    N2 = 1000
    x2 = jax.random.normal(jax.random.PRNGKey(1), (N2, D), dtype=jnp.float32) * 2.0
    out2 = jax.block_until_ready(normalisation(x2, input_min, input_max, output_range))
    assert out2.shape == (N2, D)
    assert jnp.allclose(out2, ref_fn(x2), atol=1e-5, rtol=1e-5)

    # 3) larger divisible-N multi-block path.
    N3 = 4096
    x3 = jax.random.normal(jax.random.PRNGKey(2), (N3, D), dtype=jnp.float32) * 2.0
    out3 = jax.block_until_ready(normalisation(x3, input_min, input_max, output_range))
    assert out3.shape == (N3, D)
    assert jnp.allclose(out3, ref_fn(x3), atol=1e-5, rtol=1e-5)

    print("KERNEL_OK")
</pallas_src>

<mosaic_0001>
module attributes {stable_mosaic.version = 11 : i64} {
  func.func @_normalisation_kernel(%arg0: i32, %arg1: memref<1x128xf32, #tpu.memory_space<vmem>>, %arg2: memref<1x128xf32, #tpu.memory_space<vmem>>, %arg3: memref<2x128xf32, #tpu.memory_space<vmem>>, %arg4: memref<2x128xf32, #tpu.memory_space<vmem>>) attributes {dimension_semantics = [#tpu.dimension_semantics<parallel>], iteration_bounds = array<i64: 1>, scalar_prefetch = 0 : i64, scratch_operands = 0 : i64, tpu.core_type = #tpu.core_type<tc>, window_params = [{pipeline_mode = #tpu.pipeline_mode<synchronous>, transform_indices = @transform_0, window_bounds = array<i64: 1, 128>}, {pipeline_mode = #tpu.pipeline_mode<synchronous>, transform_indices = @transform_1, window_bounds = array<i64: 1, 128>}, {transform_indices = @transform_2, window_bounds = array<i64: 2, 128>}, {transform_indices = @transform_3, window_bounds = array<i64: 2, 128>}]} {
    %c0 = arith.constant 0 : index
    %c0_0 = arith.constant 0 : index
    %0 = vector.load %arg3[%c0, %c0_0] : memref<2x128xf32, #tpu.memory_space<vmem>>, vector<2x128xf32>
    %c0_1 = arith.constant 0 : index
    %c0_2 = arith.constant 0 : index
    %1 = vector.load %arg1[%c0_1, %c0_2] : memref<1x128xf32, #tpu.memory_space<vmem>>, vector<1x128xf32>
    %2 = vector.broadcast %1 : vector<1x128xf32> to vector<2x128xf32>
    %3 = arith.mulf %0, %2 : vector<2x128xf32>
    %c0_3 = arith.constant 0 : index
    %c0_4 = arith.constant 0 : index
    %4 = vector.load %arg2[%c0_3, %c0_4] : memref<1x128xf32, #tpu.memory_space<vmem>>, vector<1x128xf32>
    %5 = vector.broadcast %4 : vector<1x128xf32> to vector<2x128xf32>
    %6 = arith.addf %3, %5 : vector<2x128xf32>
    %c0_5 = arith.constant 0 : index
    %c0_6 = arith.constant 0 : index
    %7 = vector.load %arg4[%c0_5, %c0_6] : memref<2x128xf32, #tpu.memory_space<vmem>>, vector<2x128xf32>
    tpu.vector_store %arg4[%c0_5, %c0_6], %6 {strides = array<i32>} : memref<2x128xf32, #tpu.memory_space<vmem>>, vector<2x128xf32>,
    return
  }
  func.func @transform_0(%arg0: i32) -> (i32, i32) {
    %c0_i32 = arith.constant 0 : i32
    %c0_i32_0 = arith.constant 0 : i32
    %c0_i32_1 = arith.constant 0 : i32
    return %c0_i32, %c0_i32_0 : i32, i32
  }
  func.func @transform_1(%arg0: i32) -> (i32, i32) {
    %c0_i32 = arith.constant 0 : i32
    %c0_i32_0 = arith.constant 0 : i32
    %c0_i32_1 = arith.constant 0 : i32
    return %c0_i32, %c0_i32_0 : i32, i32
  }
  func.func @transform_2(%arg0: i32) -> (i32, i32) {
    %c0_i32 = arith.constant 0 : i32
    %c0_i32_0 = arith.constant 0 : i32
    return %arg0, %c0_i32 : i32, i32
  }
  func.func @transform_3(%arg0: i32) -> (i32, i32) {
    %c0_i32 = arith.constant 0 : i32
    %c0_i32_0 = arith.constant 0 : i32
    return %arg0, %c0_i32 : i32, i32
  }
}

</mosaic_0001>

<bundles_post_ra>
// kernel: tpu_custom_call.1
= control target key start
LH: loop header
LB: loop body
LE: loop exit
PB: predicated region body
PF: predicated region fallthrough
CT: control target
= control target key end

     0   :  { %8 = vsyncpa [#allocation3], 0  ;;  %s230_s0 = inlined_call_operand.hbm [shape: f32[1,128], index: 0, kind: input, shape index: {}]   ;;  %s231_s1 = inlined_call_operand.hbm [shape: f32[1,128], index: 1, kind: input, shape index: {}]   ;;  %s232_s2 = inlined_call_operand.hbm [shape: f32[2,128], index: 2, kind: input, shape index: {}]   ;;  %s233_s3 = inlined_call_operand.hbm [shape: f32[2,128], index: 3, kind: output, shape index: {}]  }
   0x1   :  { %9 = vsyncpa [#allocation6], 0  ;;  %s27_s14 = sshll.u32 %s231_s1, 4  ;;  %s28_s14 = int_to_ptr.hbm [resolvable:$true] %s27_s14 }
   0x2   :  { %10 = vsyncpa [#allocation4], 0  ;;  %s194_s15 = smov [#allocation5]   ;;  %s16_s19 = sshll.u32 %s230_s0, 4  ;;  %s17_s19 = int_to_ptr.hbm [resolvable:$true] %s16_s19 }
   0x3   :  { %s29_s16 = sshll.u32 %s194_s15, 4  ;;  %s195_s20 = smov [#allocation2]   ;;  %s30_s16 = int_to_ptr.vmem [resolvable:$true] %s29_s16 }
   0x4   :  { %32 = dma.hbm_to_vmem [thread:$0]  %s28_s14, 16, %s30_s16, [#allocation6]  }
   0x5   :  { %s18_s21 = sshll.u32 %s195_s20, 4  ;;  %s38_s24 = sshll.u32 %s232_s2, 4  ;;  %s19_s21 = int_to_ptr.vmem [resolvable:$true] %s18_s21  ;;  %s39_s24 = int_to_ptr.hbm [resolvable:$true] %s38_s24 }
   0x6   :  { %21 = dma.hbm_to_vmem [thread:$0]  %s17_s19, 16, %s19_s21, [#allocation3]  }
   0x7   :  { %s196_s1 = smov [#allocation7]  }
   0x8   :  { %s40_s25 = sshll.u32 %s196_s1, 4  ;;  %s41_s25 = int_to_ptr.vmem [resolvable:$true] %s40_s25 }
   0x9   :  { %43 = dma.hbm_to_vmem [thread:$0]  %s39_s24, 32, %s41_s25, [#allocation6]  }
   0xa   :  { %188 = dma.done.wait [#allocation3], 16  }
   0xb   :  { %189 = vsyncadd [#allocation3], 4294967280 }
   0xc   :  { %190 = dma.done.wait [#allocation6], 48  }
   0xd   :  { %191 = vsyncadd [#allocation6], 4294967248  ;;  %v56_v0 = vld [vmem:[#allocation7] sm:$0x3]  ;;  %v90_v1 = vld [vmem:[#allocation2] ss:$0 sm:$0xff] }
   0xe   :  { %v91_v2 = vld [vmem:[#allocation5] ss:$0 sm:$0xff]  ;;  %s197_s0 = smov [#allocation8]   ;;  %s75_s2 = sshll.u32 %s233_s3, 4  ;;  %v61_v3 = vmul.f32 %v90_v1, %v56_v0  ;;  %s76_s2 = int_to_ptr.hbm [resolvable:$true] %s75_s2 }
   0xf   :  { %s73_s26 = sshll.u32 %s197_s0, 4  ;;  %s74_s26 = int_to_ptr.vmem [resolvable:$true] %s73_s26 }
  0x10   :  { %v66_v4 = vadd.f32 %v91_v2, %v61_v3 }
  0x12   :  { %67 = vst [vmem:[#allocation8] sm:$0x3] %v66_v4 }
  0x13   :  { %78 = dma.vmem_to_hbm [thread:$0]  %s74_s26, 32, %s76_s2, [#allocation4]  }
  0x14   :  { %192 = dma.done.wait [#allocation4], 32  }
  0x15   :  { %193 = vsyncadd [#allocation4], 4294967264 }
  0x16   :  { %83 = vsyncpa [#allocation3], 1 }
  0x17   :  { %84 = vsyncpa [#allocation6], 1 }
  0x18   :  { %85 = vsyncpa [#allocation4], 1 }

</bundles_post_ra>
